<compile_context>
chip_gen: v7x
topology: tpu7x:2x2x1
jax: 0.10.0
libtpu: 0.0.40
codegen_flags: <defaults>
</compile_context>

<pallas_src>
import jax
import jax.numpy as jnp
from jax.experimental import pallas as pl
from jax.experimental.pallas import tpu as pltpu


def _round_up(n: int, m: int) -> int:
    return ((n + m - 1) // m) * m


def _mlp_kernel_nobias(x_ref, w1t_ref, w2t_ref, o_ref, h_ref):
    # x_ref: (bm, IN_P), w1t_ref: (IN_P, H_P), w2t_ref: (H_P, OUT_P)
    h = jnp.dot(x_ref[...], w1t_ref[...], preferred_element_type=jnp.float32)
    h_ref[...] = h.astype(h_ref.dtype)            # intermediate in VMEM scratch
    y = jnp.dot(h_ref[...], w2t_ref[...], preferred_element_type=jnp.float32)
    o_ref[...] = y.astype(o_ref.dtype)            # lane-dense (bm, OUT_P) store


def _mlp_kernel_bias(x_ref, w1t_ref, b1_ref, w2t_ref, b2_ref, o_ref, h_ref):
    h = jnp.dot(x_ref[...], w1t_ref[...], preferred_element_type=jnp.float32)
    h_ref[...] = (h + b1_ref[...]).astype(h_ref.dtype)   # (bm,H_P)+(1,H_P) bcast
    y = jnp.dot(h_ref[...], w2t_ref[...], preferred_element_type=jnp.float32)
    o_ref[...] = (y + b2_ref[...]).astype(o_ref.dtype)


def linear_model_bp(x, W1, W2, b1=None, b2=None, *, block_m=512,
                    compute_dtype=jnp.bfloat16):
    """Forward pass of LinearModel_BP:  (x @ W1.T + b1) @ W2.T + b2.

    x  : (B, input_shape) float32
    W1 : (hidden, input_shape)
    W2 : (output_shape, hidden)
    b1 : (hidden,) or None ; b2 : (output_shape,) or None
    """
    B, in_dim = x.shape
    hidden = W1.shape[0]
    out_dim = W2.shape[0]
    out_dtype = x.dtype

    LANE = 128
    IN_P = _round_up(in_dim, LANE)     # lane-align K of matmul 1
    H_P = _round_up(hidden, LANE)      # lane-align N of matmul 1 / K of matmul 2
    OUT_P = _round_up(out_dim, LANE)   # lane-dense output slab

    # Big batch tile (multiple of 8), grid over padded batch.
    bm = min(_round_up(B, 8), _round_up(block_m, 8))
    Bp = _round_up(B, bm)

    # glue: pad + transpose weights and cast MXU operands (zero padding keeps
    # the math exact).  TODO(synk): hoist this weight prep to parameter init so
    # it is not an un-hidden HBM copy per forward call (negligible at this size).
    xp = jnp.zeros((Bp, IN_P), compute_dtype).at[:B, :in_dim].set(
        x.astype(compute_dtype))
    w1t = jnp.zeros((IN_P, H_P), compute_dtype).at[:in_dim, :hidden].set(
        W1.T.astype(compute_dtype))
    w2t = jnp.zeros((H_P, OUT_P), compute_dtype).at[:hidden, :out_dim].set(
        W2.T.astype(compute_dtype))

    grid = (pl.cdiv(Bp, bm),)
    x_spec = pl.BlockSpec((bm, IN_P), lambda i: (i, 0))       # streamed batch tile
    w1_spec = pl.BlockSpec((IN_P, H_P), lambda i: (0, 0))     # resident weight
    w2_spec = pl.BlockSpec((H_P, OUT_P), lambda i: (0, 0))    # resident weight
    out_spec = pl.BlockSpec((bm, OUT_P), lambda i: (i, 0))    # lane-dense output
    scratch = [pltpu.VMEM((bm, H_P), compute_dtype)]          # intermediate h

    compiler_params = pltpu.CompilerParams(
        dimension_semantics=("parallel",),   # batch axis sharded across TCs (v7x)
        vmem_limit_bytes=32 * 1024 * 1024,   # explicit budget (fits v7x 64 MiB)
    )
    out_shape = jax.ShapeDtypeStruct((Bp, OUT_P), out_dtype)

    use_bias = (b1 is not None) or (b2 is not None)
    if use_bias:
        b1v = jnp.zeros((hidden,), jnp.float32) if b1 is None else b1
        b2v = jnp.zeros((out_dim,), jnp.float32) if b2 is None else b2
        b1p = jnp.zeros((1, H_P), jnp.float32).at[0, :hidden].set(
            b1v.astype(jnp.float32))
        b2p = jnp.zeros((1, OUT_P), jnp.float32).at[0, :out_dim].set(
            b2v.astype(jnp.float32))
        out = pl.pallas_call(
            _mlp_kernel_bias,
            out_shape=out_shape,
            grid_spec=pltpu.PrefetchScalarGridSpec(
                num_scalar_prefetch=0,
                grid=grid,
                in_specs=[x_spec,
                          w1_spec,
                          pl.BlockSpec((1, H_P), lambda i: (0, 0)),
                          w2_spec,
                          pl.BlockSpec((1, OUT_P), lambda i: (0, 0))],
                out_specs=out_spec,
                scratch_shapes=scratch),
            compiler_params=compiler_params,
        )(xp, w1t, b1p, w2t, b2p)
    else:
        out = pl.pallas_call(
            _mlp_kernel_nobias,
            out_shape=out_shape,
            grid_spec=pltpu.PrefetchScalarGridSpec(
                num_scalar_prefetch=0,
                grid=grid,
                in_specs=[x_spec, w1_spec, w2_spec],
                out_specs=out_spec,
                scratch_shapes=scratch),
            compiler_params=compiler_params,
        )(xp, w1t, w2t)

    # Strip batch / lane padding.
    return out[:B, :out_dim]


if __name__ == "__main__":
    # Module hyper-params (small, consistent with LinearModel_BP's forward)
    batch = 8
    input_shape = 32
    hidden_units = 64
    output_shape = 16

    key = jax.random.PRNGKey(0)
    kx, k1, k2, kb1, kb2 = jax.random.split(key, 5)

    x = jax.random.normal(kx, (batch, input_shape), dtype=jnp.float32)
    W1 = jax.random.normal(k1, (hidden_units, input_shape), dtype=jnp.float32)
    W2 = jax.random.normal(k2, (output_shape, hidden_units), dtype=jnp.float32)

    # Pure-JAX f32 reference (module default: use_bias=False).
    ref = (x @ W1.T) @ W2.T

    # 1) exact-math path (f32 MXU operands), no bias -- module default.
    out_f32 = jax.block_until_ready(
        linear_model_bp(x, W1, W2, compute_dtype=jnp.float32))
    assert out_f32.shape == (batch, output_shape)
    assert jnp.allclose(out_f32, ref, atol=1e-3, rtol=1e-3), "f32 mismatch"

    # 2) default bf16-operand / f32-accumulate path (MXU-friendly); looser check.
    out_bf16 = jax.block_until_ready(linear_model_bp(x, W1, W2))
    rel_err = jnp.max(jnp.abs(out_bf16.astype(jnp.float32) - ref)) / (
        jnp.max(jnp.abs(ref)) + 1e-6)
    assert rel_err < 5e-2, f"bf16 mismatch: rel_err={rel_err}"

    # 3) bias path (use_bias=True; biases are learnable so test nonzero values).
    b1 = 0.1 * jax.random.normal(kb1, (hidden_units,), dtype=jnp.float32)
    b2 = 0.1 * jax.random.normal(kb2, (output_shape,), dtype=jnp.float32)
    ref_b = (x @ W1.T + b1) @ W2.T + b2
    out_b = jax.block_until_ready(
        linear_model_bp(x, W1, W2, b1, b2, compute_dtype=jnp.float32))
    assert jnp.allclose(out_b, ref_b, atol=1e-3, rtol=1e-3), "bias mismatch"

    print("KERNEL_OK")
</pallas_src>

<mosaic_0001>
module attributes {stable_mosaic.version = 11 : i64} {
  func.func @_mlp_kernel_nobias(%arg0: i32, %arg1: memref<8x128xf32, #tpu.memory_space<vmem>>, %arg2: memref<128x128xf32, #tpu.memory_space<vmem>>, %arg3: memref<128x128xf32, #tpu.memory_space<vmem>>, %arg4: memref<8x128xf32, #tpu.memory_space<vmem>>, %arg5: memref<8x128xf32, #tpu.memory_space<vmem>>) attributes {dimension_semantics = [#tpu.dimension_semantics<parallel>], iteration_bounds = array<i64: 1>, scalar_prefetch = 0 : i64, scratch_operands = 1 : i64, tpu.core_type = #tpu.core_type<tc>, window_params = [{transform_indices = @transform_0, window_bounds = array<i64: 8, 128>}, {pipeline_mode = #tpu.pipeline_mode<synchronous>, transform_indices = @transform_1, window_bounds = array<i64: 128, 128>}, {pipeline_mode = #tpu.pipeline_mode<synchronous>, transform_indices = @transform_2, window_bounds = array<i64: 128, 128>}, {transform_indices = @transform_3, window_bounds = array<i64: 8, 128>}]} {
    %c0 = arith.constant 0 : index
    %c0_0 = arith.constant 0 : index
    %0 = vector.load %arg1[%c0, %c0_0] : memref<8x128xf32, #tpu.memory_space<vmem>>, vector<8x128xf32>
    %c0_1 = arith.constant 0 : index
    %c0_2 = arith.constant 0 : index
    %1 = vector.load %arg2[%c0_1, %c0_2] : memref<128x128xf32, #tpu.memory_space<vmem>>, vector<128x128xf32>
    %cst = arith.constant dense<0.000000e+00> : vector<8x128xf32>
    %2 = tpu.matmul %0, %1, %cst {dimension_numbers = #tpu.dot_dimension_numbers<[1], [0], [0], [1], [0, 0, 1, 1], [], []>} : vector<8x128xf32>, vector<128x128xf32>, vector<8x128xf32> -> vector<8x128xf32>
    %c0_3 = arith.constant 0 : index
    %c0_4 = arith.constant 0 : index
    %3 = vector.load %arg5[%c0_3, %c0_4] : memref<8x128xf32, #tpu.memory_space<vmem>>, vector<8x128xf32>
    tpu.vector_store %arg5[%c0_3, %c0_4], %2 {strides = array<i32>} : memref<8x128xf32, #tpu.memory_space<vmem>>, vector<8x128xf32>,
    %c0_5 = arith.constant 0 : index
    %c0_6 = arith.constant 0 : index
    %4 = vector.load %arg5[%c0_5, %c0_6] : memref<8x128xf32, #tpu.memory_space<vmem>>, vector<8x128xf32>
    %c0_7 = arith.constant 0 : index
    %c0_8 = arith.constant 0 : index
    %5 = vector.load %arg3[%c0_7, %c0_8] : memref<128x128xf32, #tpu.memory_space<vmem>>, vector<128x128xf32>
    %cst_9 = arith.constant dense<0.000000e+00> : vector<8x128xf32>
    %6 = tpu.matmul %4, %5, %cst_9 {dimension_numbers = #tpu.dot_dimension_numbers<[1], [0], [0], [1], [0, 0, 1, 1], [], []>} : vector<8x128xf32>, vector<128x128xf32>, vector<8x128xf32> -> vector<8x128xf32>
    %c0_10 = arith.constant 0 : index
    %c0_11 = arith.constant 0 : index
    %7 = vector.load %arg4[%c0_10, %c0_11] : memref<8x128xf32, #tpu.memory_space<vmem>>, vector<8x128xf32>
    tpu.vector_store %arg4[%c0_10, %c0_11], %6 {strides = array<i32>} : memref<8x128xf32, #tpu.memory_space<vmem>>, vector<8x128xf32>,
    return
  }
  func.func @transform_0(%arg0: i32) -> (i32, i32) {
    %c0_i32 = arith.constant 0 : i32
    %c0_i32_0 = arith.constant 0 : i32
    return %arg0, %c0_i32 : i32, i32
  }
  func.func @transform_1(%arg0: i32) -> (i32, i32) {
    %c0_i32 = arith.constant 0 : i32
    %c0_i32_0 = arith.constant 0 : i32
    %c0_i32_1 = arith.constant 0 : i32
    return %c0_i32, %c0_i32_0 : i32, i32
  }
  func.func @transform_2(%arg0: i32) -> (i32, i32) {
    %c0_i32 = arith.constant 0 : i32
    %c0_i32_0 = arith.constant 0 : i32
    %c0_i32_1 = arith.constant 0 : i32
    return %c0_i32, %c0_i32_0 : i32, i32
  }
  func.func @transform_3(%arg0: i32) -> (i32, i32) {
    %c0_i32 = arith.constant 0 : i32
    %c0_i32_0 = arith.constant 0 : i32
    return %arg0, %c0_i32 : i32, i32
  }
}

</mosaic_0001>

<bundles_post_ra>
// kernel: tpu_custom_call.1
= control target key start
LH: loop header
LB: loop body
LE: loop exit
PB: predicated region body
PF: predicated region fallthrough
CT: control target
= control target key end

     0   :  { %8 = vsyncpa [#allocation4], 0  ;;  %s600_s0 = inlined_call_operand.hbm [shape: f32[8,128], index: 0, kind: input, shape index: {}]   ;;  %s601_s1 = inlined_call_operand.hbm [shape: f32[128,128], index: 1, kind: input, shape index: {}]   ;;  %s602_s2 = inlined_call_operand.hbm [shape: f32[128,128], index: 2, kind: input, shape index: {}]   ;;  %s603_s3 = inlined_call_operand.hbm [shape: f32[8,128], index: 3, kind: output, shape index: {}]  }
   0x1   :  { %9 = vsyncpa [#allocation7], 0 }
   0x2   :  { %10 = vsyncpa [#allocation5], 0  ;;  %s501_s12 = smov [#allocation6]   ;;  %s407_s16 = scalar_lea.hbm %s601_s1, 2048 }
   0x3   :  { %s26_s13 = sshll.u32 %s501_s12, 4  ;;  %p408_p0 = scmp.ne.s32.totalorder %s601_s1, %s407_s16  ;;  %s27_s13 = int_to_ptr.vmem [resolvable:$true] %s26_s13 }
   0x4   :  { %p411_p1 = scmp.lt.u32.totalorder %s407_s16, %s601_s1 }
   0x6   :  { %p413_p2 = pnand %p411_p1, %p408_p0 }
   0x8   :  { %416 = shalt.err (!%p413_p2)
}
   0x9   :  { %s417_s21 = scalar_lea.vmem %s27_s13, 2048  ;;  %p422_p4 = scmp.lt.s32.totalorder %s27_s13, %s27_s13 }
   0xa   :  { %p418_p3 = scmp.ne.s32.totalorder %s27_s13, %s417_s21  ;;  %p423_p5 = scmp.lt.s32.totalorder %s417_s21, %s417_s21 }
   0xc   :  { %p424_p6 = por %p423_p5, %p422_p4 }
   0xe   :  { %p425_p7 = pnand %p424_p6, %p418_p3 }
  0x10   :  { %428 = shalt.err (!%p425_p7)
}
  0x11   :  { %s502_s22 = smov 128   ;;  %s503_s23 = smov 8  }
  0x12   :  { %32 = dma.hbm_to_vmem [thread:$0]  %s601_s1, 2048, %s27_s13, [#allocation7], %s502_s22, %s502_s22, %s503_s23  }
  0x13   :  { %s504_s26 = smov [#allocation3]   ;;  %s505_s28 = smov [#allocation8]  }
  0x14   :  { %s17_s27 = sshll.u32 %s504_s26, 4  ;;  %s38_s29 = sshll.u32 %s505_s28, 4  ;;  %s18_s27 = int_to_ptr.vmem [resolvable:$true] %s17_s27  ;;  %s39_s29 = int_to_ptr.vmem [resolvable:$true] %s38_s29 }
  0x15   :  { %s429_s5 = scalar_lea.hbm %s600_s0, 128 }
  0x16   :  { %p430_p8 = scmp.ne.s32.totalorder %s600_s0, %s429_s5  ;;  %p433_p9 = scmp.lt.u32.totalorder %s429_s5, %s600_s0 }
  0x18   :  { %p435_p10 = pnand %p433_p9, %p430_p8 }
  0x1a   :  { %438 = shalt.err (!%p435_p10)
}
  0x1b   :  { %s439_s1 = scalar_lea.vmem %s18_s27, 128  ;;  %p444_p12 = scmp.lt.s32.totalorder %s18_s27, %s18_s27 }
  0x1c   :  { %p440_p11 = scmp.ne.s32.totalorder %s18_s27, %s439_s1  ;;  %p445_p13 = scmp.lt.s32.totalorder %s439_s1, %s439_s1 }
  0x1e   :  { %p446_p0 = por %p445_p13, %p444_p12 }
  0x20   :  { %p447_p1 = pnand %p446_p0, %p440_p11 }
  0x22   :  { %450 = shalt.err (!%p447_p1)
}
  0x23   :  { %20 = dma.hbm_to_vmem [thread:$0]  %s600_s0, 128, %s18_s27, [#allocation4]  }
  0x24   :  { %s451_s14 = scalar_lea.hbm %s602_s2, 2048 }
  0x25   :  { %p452_p2 = scmp.ne.s32.totalorder %s602_s2, %s451_s14  ;;  %p455_p3 = scmp.lt.u32.totalorder %s451_s14, %s602_s2 }
  0x27   :  { %p457_p4 = pnand %p455_p3, %p452_p2 }
  0x29   :  { %460 = shalt.err (!%p457_p4)
}
  0x2a   :  { %s461_s19 = scalar_lea.vmem %s39_s29, 2048  ;;  %p466_p6 = scmp.lt.s32.totalorder %s39_s29, %s39_s29 }
  0x2b   :  { %p462_p5 = scmp.ne.s32.totalorder %s39_s29, %s461_s19  ;;  %p467_p7 = scmp.lt.s32.totalorder %s461_s19, %s461_s19 }
  0x2d   :  { %p468_p8 = por %p467_p7, %p466_p6 }
  0x2f   :  { %p469_p9 = pnand %p468_p8, %p462_p5 }
  0x31   :  { %472 = shalt.err (!%p469_p9)
}
  0x32   :  { %44 = dma.hbm_to_vmem [thread:$0]  %s602_s2, 2048, %s39_s29, [#allocation7], %s502_s22, %s502_s22, %s503_s23  }
  0x33   :  { %495 = dma.done.wait [#allocation4], 128  }
  0x34   :  { %496 = vsyncadd [#allocation4], 4294967168 }
  0x35   :  { %497 = dma.done.wait [#allocation7], 4096  }
  0x36   :  { %498 = vsyncadd [#allocation7], 4294963200  ;;  %v506_v0 = vmov 0.0|0.0   ;;  %vm507_vm0 = vmmov 0   ;;  %v508_v1 = vmov 0.0   ;;  %v55_v2 = vld [vmem:[#allocation6] sm:$0xff] }
  0x37   :  { %350 = vmatprep.subr.bf16.mxu0 %v506_v0  ;;  %312 = vmatprep.mubr.msk.f32.mxu0 %vm507_vm0, %v508_v1  ;;  %v56_v3 = vld [vmem:[#allocation6 + $0x8] sm:$0xff]  ;;  %v57_v4 = vld [vmem:[#allocation6 + $0x10] sm:$0xff]  ;;  %v58_v6 = vld [vmem:[#allocation6 + $0x18] sm:$0xff]  ;;  %s509_s2 = smov [#allocation9]  }
  0x38   :  { %374 = vmatprep.subr.bf16.mxu1 %v506_v0  ;;  %347 = vmatprep.mubr.msk.f32.mxu1 %vm507_vm0, %v508_v1  ;;  %v351_v5 = vpack.c.bf16 %v56_v3, %v55_v2  ;;  %v354_v7 = vpack.c.bf16 %v58_v6, %v57_v4  ;;  %v59_v8 = vld [vmem:[#allocation6 + $0x20] sm:$0xff]  ;;  %v60_v9 = vld [vmem:[#allocation6 + $0x28] sm:$0xff]  ;;  %v145_v12 = vld [vmem:[#allocation8 + $0x10] sm:$0xff]  ;;  %s236_s21 = sshll.u32 %s509_s2, 4  ;;  %s237_s21 = int_to_ptr.vmem [resolvable:$true] %s236_s21 }
  0x39   :  { %v143_v10 = vld [vmem:[#allocation8] sm:$0xff]  ;;  %v144_v11 = vld [vmem:[#allocation8 + $0x8] sm:$0xff]  ;;  %v146_v13 = vld [vmem:[#allocation8 + $0x18] sm:$0xff]  ;;  %v357_v14 = vpack.c.bf16 %v60_v9, %v59_v8  ;;  %s473_s22 = scalar_lea.vmem %s237_s21, 128  ;;  %p478_p11 = scmp.lt.s32.totalorder %s237_s21, %s237_s21 }
  0x3a   :  { %352 = vmatpush3.bf16.msra.mxu0 %v351_v5  ;;  %v375_v15 = vpack.c.bf16 %v144_v11, %v143_v10  ;;  %v61_v16 = vld [vmem:[#allocation6 + $0x30] sm:$0xff]  ;;  %v62_v17 = vld [vmem:[#allocation6 + $0x38] sm:$0xff]  ;;  %v378_v18 = vpack.c.bf16 %v146_v13, %v145_v12  ;;  %v147_v19 = vld [vmem:[#allocation8 + $0x20] sm:$0xff]  ;;  %p474_p10 = scmp.ne.s32.totalorder %s237_s21, %s473_s22  ;;  %p479_p12 = scmp.lt.s32.totalorder %s473_s22, %s473_s22 }
  0x3b   :  { %353 = vmatprep.subr.bf16.mxu0 %v506_v0  ;;  %v148_v20 = vld [vmem:[#allocation8 + $0x28] sm:$0xff]  ;;  %v360_v21 = vpack.c.bf16 %v62_v17, %v61_v16  ;;  %v63_v22 = vld [vmem:[#allocation6 + $0x40] sm:$0xff]  ;;  %v149_v25 = vld [vmem:[#allocation8 + $0x30] sm:$0xff] }
  0x3c   :  { %376 = vmatpush3.bf16.msra.mxu1 %v375_v15  ;;  %v64_v23 = vld [vmem:[#allocation6 + $0x48] sm:$0xff]  ;;  %v381_v24 = vpack.c.bf16 %v148_v20, %v147_v19  ;;  %v150_v26 = vld [vmem:[#allocation8 + $0x38] sm:$0xff]  ;;  %v65_v28 = vld [vmem:[#allocation6 + $0x50] sm:$0xff]  ;;  %p480_p13 = por %p479_p12, %p478_p11 }
  0x3d   :  { %377 = vmatprep.subr.bf16.mxu1 %v506_v0  ;;  %v363_v27 = vpack.c.bf16 %v64_v23, %v63_v22  ;;  %v66_v29 = vld [vmem:[#allocation6 + $0x58] sm:$0xff]  ;;  %v384_v30 = vpack.c.bf16 %v150_v26, %v149_v25  ;;  %v151_v31 = vld [vmem:[#allocation8 + $0x40] sm:$0xff]  ;;  %v152_v32 = vld [vmem:[#allocation8 + $0x48] sm:$0xff] }
  0x3e   :  { %355 = vmatpush3.bf16.msra.mxu0 %v354_v7  ;;  %v366_v33 = vpack.c.bf16 %v66_v29, %v65_v28  ;;  %v67_v34 = vld [vmem:[#allocation6 + $0x60] sm:$0xff]  ;;  %v68_v35 = vld [vmem:[#allocation6 + $0x68] sm:$0xff]  ;;  %v387_v36 = vpack.c.bf16 %v152_v32, %v151_v31  ;;  %v153_v37 = vld [vmem:[#allocation8 + $0x50] sm:$0xff]  ;;  %p481_p0 = pnand %p480_p13, %p474_p10 }
  0x3f   :  { %356 = vmatprep.subr.bf16.mxu0 %v506_v0  ;;  %v154_v38 = vld [vmem:[#allocation8 + $0x58] sm:$0xff]  ;;  %v369_v39 = vpack.c.bf16 %v68_v35, %v67_v34  ;;  %v69_v40 = vld [vmem:[#allocation6 + $0x70] sm:$0xff]  ;;  %v155_v43 = vld [vmem:[#allocation8 + $0x60] sm:$0xff] }
  0x40   :  { %379 = vmatpush3.bf16.msra.mxu1 %v378_v18  ;;  %v70_v41 = vld [vmem:[#allocation6 + $0x78] sm:$0xff]  ;;  %v390_v42 = vpack.c.bf16 %v154_v38, %v153_v37  ;;  %v156_v44 = vld [vmem:[#allocation8 + $0x68] sm:$0xff]  ;;  %v157_v47 = vld [vmem:[#allocation8 + $0x70] sm:$0xff] }
  0x41   :  { %380 = vmatprep.subr.bf16.mxu1 %v506_v0  ;;  %v372_v45 = vpack.c.bf16 %v70_v41, %v69_v40  ;;  %v393_v46 = vpack.c.bf16 %v156_v44, %v155_v43  ;;  %v158_v48 = vld [vmem:[#allocation8 + $0x78] sm:$0xff] }
  0x42   :  { %358 = vmatpush3.bf16.msra.mxu0 %v357_v14  ;;  %v54_v49 = vld [vmem:[#allocation3] sm:$0xff]  ;;  %v396_v50 = vpack.c.bf16 %v158_v48, %v157_v47 }
  0x43   :  { %359 = vmatprep.subr.bf16.mxu0 %v506_v0 }
  0x44   :  { %382 = vmatpush3.bf16.msra.mxu1 %v381_v24 }
  0x45   :  { %383 = vmatprep.subr.bf16.mxu1 %v506_v0 }
  0x46   :  { %361 = vmatpush3.bf16.msra.mxu0 %v360_v21 }
  0x47   :  { %362 = vmatprep.subr.bf16.mxu0 %v506_v0 }
  0x48   :  { %385 = vmatpush3.bf16.msra.mxu1 %v384_v30 }
  0x49   :  { %386 = vmatprep.subr.bf16.mxu1 %v506_v0 }
  0x4a   :  { %364 = vmatpush3.bf16.msra.mxu0 %v363_v27 }
  0x4b   :  { %365 = vmatprep.subr.bf16.mxu0 %v506_v0 }
  0x4c   :  { %388 = vmatpush3.bf16.msra.mxu1 %v387_v36 }
  0x4d   :  { %389 = vmatprep.subr.bf16.mxu1 %v506_v0 }
  0x4e   :  { %367 = vmatpush3.bf16.msra.mxu0 %v366_v33 }
  0x4f   :  { %368 = vmatprep.subr.bf16.mxu0 %v506_v0 }
  0x50   :  { %391 = vmatpush3.bf16.msra.mxu1 %v390_v42 }
  0x51   :  { %392 = vmatprep.subr.bf16.mxu1 %v506_v0 }
  0x52   :  { %370 = vmatpush3.bf16.msra.mxu0 %v369_v39 }
  0x53   :  { %371 = vmatprep.subr.bf16.mxu0 %v506_v0 }
  0x54   :  { %394 = vmatpush3.bf16.msra.mxu1 %v393_v46 }
  0x55   :  { %395 = vmatprep.subr.bf16.mxu1 %v506_v0 }
  0x56   :  { %373 = vmatpush3.bf16.msra.mxu0 %v372_v45 }
  0x58   :  { %397 = vmatpush3.bf16.msra.mxu1 %v396_v50 }
  0x59   :  { %313 = vmatmul.mubr.f32.vlgmr.msra.gmra.mrb[0].mxu0 %v54_v49 }
 0x12c   :  { %v137_v51 = vpop.f32.mrb[0].mxu0 }
 0x12d   :  { %v314_v52 = vpop.f32.mrb[1].mxu0  ;;  %348 = vmatmul.mubr.f32.vlgmr.msra.gmra.mrb[0].mxu1 %v137_v51 }
 0x200   :  { %v225_v53 = vpop.f32.mrb[0].mxu1 }
 0x201   :  { %229 = vst [vmem:[#allocation9] sm:$0xff] %v225_v53  ;;  %v349_v54 = vpop.f32.mrb[1].mxu1 }
 0x202   :  { %484 = shalt.err (!%p481_p0)
}
 0x203   :  { %s485_s25 = scalar_lea.hbm %s603_s3, 128 }
 0x204   :  { %p486_p1 = scmp.ne.s32.totalorder %s603_s3, %s485_s25  ;;  %p489_p2 = scmp.lt.u32.totalorder %s485_s25, %s603_s3 }
 0x206   :  { %p491_p3 = pnand %p489_p2, %p486_p1 }
 0x208   :  { %494 = shalt.err (!%p491_p3)
}
 0x209   :  { %239 = dma.vmem_to_hbm [thread:$0]  %s237_s21, 128, %s603_s3, [#allocation5]  }
 0x20a   :  { %499 = dma.done.wait [#allocation5], 128  }
 0x20b   :  { %500 = vsyncadd [#allocation5], 4294967168 }
 0x20c   :  { %243 = vsyncpa [#allocation4], 1 }
 0x20d   :  { %244 = vsyncpa [#allocation7], 1 }
 0x20e   :  { %245 = vsyncpa [#allocation5], 1 }

</bundles_post_ra>
